<compile_context>
chip_gen: v5e
topology: v5e:2x2
jax: 0.10.0
libtpu: 0.0.40
codegen_flags: <defaults>
</compile_context>

<pallas_src>
import jax
import jax.numpy as jnp
from jax.experimental import pallas as pl
from jax.experimental.pallas import tpu as pltpu

KH = KW = 7      # conv kernel
POOL = 3         # MaxPool2d(3), stride 3, no padding
EPS = 1e-5       # BatchNorm eps


# ---------------------------------------------------------------------------
# Fused per-sample kernel
# ---------------------------------------------------------------------------
def _fused_kernel(p_ref, wc_ref, sh_ref, w3_ref, b1_ref, w2_ref, b2_ref, o_ref):
    """One batch sample per grid step.

    p_ref : (1, 9, K, P) bf16  im2col patches; dim 1 = pool-window position,
                               K = kh*kw*ic (sublanes), P = ph*pw (lanes).
    wc_ref: (OC, K)      bf16  conv weight with BN scale folded in.
    sh_ref: (OC, 1)      f32   folded conv-bias / BN shift.
    w3_ref: (OC, P, 128) bf16  fc1 weight, torch (C,H,W) flatten order.
    b1_ref: (1, 128) f32 ; w2_ref: (1, 128) f32 ; b2_ref: (1, 1) f32.
    o_ref : (1, 8, 128)  f32   scalar result broadcast (wrapper reads [0,0,0]).
    """
    oc = wc_ref.shape[0]
    n_win = p_ref.shape[1]

    wc = wc_ref[...]                                        # hoist (OC, K) load

    # Conv + BN + ReLU + MaxPool, channels on sublanes / spatial on lanes.
    acc = jnp.dot(wc, p_ref[0, 0], preferred_element_type=jnp.float32)
    for d in range(1, n_win):
        acc = jnp.maximum(
            acc, jnp.dot(wc, p_ref[0, d], preferred_element_type=jnp.float32))
    pooled = jnp.maximum(acc + sh_ref[...], 0.0)            # (OC, P) f32

    # fc1 + ReLU: contract over (channel, pooled-spatial) as OC small MXU dots.
    h = b1_ref[...]                                         # (1, 128) f32
    for c in range(oc):
        lhs = pooled[c:c + 1, :].astype(jnp.bfloat16)       # (1, P)
        h = h + jnp.dot(lhs, w3_ref[c], preferred_element_type=jnp.float32)
    h = jnp.maximum(h, 0.0)                                 # (1, 128)

    # fc2 (output width 1 -> cheap lane reduce instead of a 1-lane matmul).
    out = jnp.sum(h * w2_ref[...], axis=1, keepdims=True) + b2_ref[...]  # (1,1)
    o_ref[...] = jnp.broadcast_to(out.reshape(1, 1, 1), o_ref.shape)


# ---------------------------------------------------------------------------
# Wrapper: layout prep (glue) + single pallas_call
# ---------------------------------------------------------------------------
def conv1net_forward(params, x_nchw):
    x = jnp.transpose(x_nchw, (0, 2, 3, 1)).astype(jnp.float32)   # NCHW -> NHWC
    N, H, W, IC = x.shape
    OC = params["conv_w"].shape[0]
    oh, ow = H - KH + 1, W - KW + 1
    ph, pw = oh // POOL, ow // POOL
    P = ph * pw
    K = KH * KW * IC
    NWIN = POOL * POOL

    # --- im2col grouped by pool-window position, transposed (K on sublanes,
    #     pooled spatial on lanes).  patches[n, d, k, p] = x[n, 3py+dy+i, 3px+dx+j, c]
    #     with d = dy*3+dx, k = (i*KW+j)*IC+c, p = py*pw+px.
    cols = [x[:, i:i + oh, j:j + ow, :] for i in range(KH) for j in range(KW)]
    pat = jnp.stack(cols, axis=3).reshape(N, oh, ow, K)
    pat = pat[:, :ph * POOL, :pw * POOL, :]
    pat = pat.reshape(N, ph, POOL, pw, POOL, K).transpose(0, 2, 4, 5, 1, 3)
    patches = pat.reshape(N, NWIN, K, P).astype(jnp.bfloat16)

    # --- fold BatchNorm (eval) into conv weight / bias.
    scale = params["bn_gamma"] / jnp.sqrt(params["bn_var"] + EPS)
    w_t = jnp.transpose(params["conv_w"], (0, 2, 3, 1)).reshape(OC, K)  # (i,j,c)
    w_conv = (w_t * scale[:, None]).astype(jnp.bfloat16)                # (OC, K)
    shift = ((params["conv_b"] - params["bn_mean"]) * scale
             + params["bn_beta"]).reshape(OC, 1).astype(jnp.float32)

    # --- fc weights in kernel-friendly layouts (torch CHW flatten preserved).
    w3 = params["fc1_w"].reshape(OC, P, 128).astype(jnp.bfloat16)       # (OC,P,128)
    b1 = params["fc1_b"].reshape(1, 128).astype(jnp.float32)
    w2 = params["fc2_w"].reshape(1, 128).astype(jnp.float32)
    b2 = params["fc2_b"].reshape(1, 1).astype(jnp.float32)

    out3 = pl.pallas_call(
        _fused_kernel,
        out_shape=jax.ShapeDtypeStruct((N, 8, 128), jnp.float32),
        grid_spec=pltpu.PrefetchScalarGridSpec(
            num_scalar_prefetch=0,
            grid=(N,),
            in_specs=[
                pl.BlockSpec((1, NWIN, K, P), lambda n: (n, 0, 0, 0)),  # patches
                pl.BlockSpec((OC, K), lambda n: (0, 0)),                # conv w
                pl.BlockSpec((OC, 1), lambda n: (0, 0)),                # shift
                pl.BlockSpec((OC, P, 128), lambda n: (0, 0, 0)),        # fc1 w
                pl.BlockSpec((1, 128), lambda n: (0, 0)),               # fc1 b
                pl.BlockSpec((1, 128), lambda n: (0, 0)),               # fc2 w
                pl.BlockSpec((1, 1), lambda n: (0, 0)),                 # fc2 b
            ],
            out_specs=pl.BlockSpec((1, 8, 128), lambda n: (n, 0, 0)),
        ),
        compiler_params=pltpu.CompilerParams(
            dimension_semantics=("parallel",)),
    )(patches, w_conv, shift, w3, b1, w2, b2)

    return out3[:, 0, 0].reshape(N, 1)


# ---------------------------------------------------------------------------
# Pure-JAX reference (independent path: lax.conv + reduce_window)
# ---------------------------------------------------------------------------
def reference_forward(params, x_nchw):
    scale = params["bn_gamma"] / jnp.sqrt(params["bn_var"] + EPS)
    y = jax.lax.conv_general_dilated(
        x_nchw, params["conv_w"], window_strides=(1, 1), padding="VALID",
        dimension_numbers=("NCHW", "OIHW", "NCHW"))
    y = y + params["conv_b"][None, :, None, None]
    y = (y - params["bn_mean"][None, :, None, None]) * scale[None, :, None, None] \
        + params["bn_beta"][None, :, None, None]
    y = jnp.maximum(y, 0.0)                                   # ConvBlock ReLU (+ extra ReLU is idempotent)
    y = jax.lax.reduce_window(y, -jnp.inf, jax.lax.max,
                              (1, 1, POOL, POOL), (1, 1, POOL, POOL), "VALID")
    flat = y.reshape(y.shape[0], -1)                          # torch.flatten: (C,H,W) order
    h = jnp.maximum(flat @ params["fc1_w"] + params["fc1_b"], 0.0)
    return h @ params["fc2_w"] + params["fc2_b"]


# ---------------------------------------------------------------------------
# Deterministic synthetic parameters (shapes from Conv1Net.__init__)
# ---------------------------------------------------------------------------
def init_params(key, in_channels=3, out_channels=8, image_size=(39, 39)):
    oh, ow = image_size[0] - KH + 1, image_size[1] - KW + 1
    ph, pw = oh // POOL, ow // POOL
    flat_dim = out_channels * ph * pw
    ks = jax.random.split(key, 10)
    rnd = lambda k, shape, s=0.1: jax.random.normal(k, shape, jnp.float32) * s
    p = {}
    p["conv_w"] = rnd(ks[0], (out_channels, in_channels, KH, KW))
    p["conv_b"] = rnd(ks[1], (out_channels,))
    p["bn_gamma"] = 1.0 + rnd(ks[2], (out_channels,))
    p["bn_beta"] = rnd(ks[3], (out_channels,))
    p["bn_mean"] = rnd(ks[4], (out_channels,))
    p["bn_var"] = 1.0 + jnp.abs(rnd(ks[5], (out_channels,)))
    p["fc1_w"] = rnd(ks[6], (flat_dim, 128), 0.05)            # stored as (in, out)
    p["fc1_b"] = rnd(ks[7], (128,))
    p["fc2_w"] = rnd(ks[8], (128, 1), 0.05)
    p["fc2_b"] = rnd(ks[9], (1,))
    return p


if __name__ == "__main__":
    # Conv1Net params: {'in_channels': 3, 'out_channels': 8, 'image_size': (39, 39)}
    # shape trace: 39 -conv7-> 33 -maxpool3-> 11  =>  flat = 8*11*11 = 968
    key = jax.random.PRNGKey(0)
    pkey, xkey = jax.random.split(key)
    image_size = (39, 39)
    params = init_params(pkey, in_channels=3, out_channels=8, image_size=image_size)
    x = jax.random.normal(xkey, (2, 3, *image_size), jnp.float32)   # NCHW like PyTorch

    fwd = jax.jit(conv1net_forward)
    out = jax.block_until_ready(fwd(params, x))
    assert out.shape == (2, 1) and out.dtype == jnp.float32

    ref = reference_forward(params, x)
    err = float(jnp.max(jnp.abs(out - ref)) / (jnp.max(jnp.abs(ref)) + 1e-6))
    assert err < 0.08, f"kernel/reference mismatch: normalized err = {err}"

    print("KERNEL_OK")
</pallas_src>

<mosaic_0001>
module attributes {stable_mosaic.version = 11 : i64} {
  func.func @_fused_kernel(%arg0: i32, %arg1: memref<1x9x147x121xbf16, #tpu.memory_space<vmem>>, %arg2: memref<8x147xbf16, #tpu.memory_space<vmem>>, %arg3: memref<8x1xf32, #tpu.memory_space<vmem>>, %arg4: memref<8x121x128xbf16, #tpu.memory_space<vmem>>, %arg5: memref<1x128xf32, #tpu.memory_space<vmem>>, %arg6: memref<1x128xf32, #tpu.memory_space<vmem>>, %arg7: memref<1x1xf32, #tpu.memory_space<vmem>>, %arg8: memref<1x8x128xf32, #tpu.memory_space<vmem>>) attributes {dimension_semantics = [#tpu.dimension_semantics<parallel>], iteration_bounds = array<i64: 2>, scalar_prefetch = 0 : i64, scratch_operands = 0 : i64, tpu.core_type = #tpu.core_type<tc>, window_params = [{transform_indices = @transform_0, window_bounds = array<i64: 1, 9, 147, 121>}, {pipeline_mode = #tpu.pipeline_mode<synchronous>, transform_indices = @transform_1, window_bounds = array<i64: 8, 147>}, {pipeline_mode = #tpu.pipeline_mode<synchronous>, transform_indices = @transform_2, window_bounds = array<i64: 8, 1>}, {pipeline_mode = #tpu.pipeline_mode<synchronous>, transform_indices = @transform_3, window_bounds = array<i64: 8, 121, 128>}, {pipeline_mode = #tpu.pipeline_mode<synchronous>, transform_indices = @transform_4, window_bounds = array<i64: 1, 128>}, {pipeline_mode = #tpu.pipeline_mode<synchronous>, transform_indices = @transform_5, window_bounds = array<i64: 1, 128>}, {pipeline_mode = #tpu.pipeline_mode<synchronous>, transform_indices = @transform_6, window_bounds = array<i64: 1, 1>}, {transform_indices = @transform_7, window_bounds = array<i64: 1, 8, 128>}]} {
    %c0 = arith.constant 0 : index
    %c0_0 = arith.constant 0 : index
    %0 = vector.load %arg2[%c0, %c0_0] : memref<8x147xbf16, #tpu.memory_space<vmem>>, vector<8x147xbf16>
    %c0_1 = arith.constant 0 : index
    %c0_2 = arith.constant 0 : index
    %c0_3 = arith.constant 0 : index
    %c0_4 = arith.constant 0 : index
    %1 = vector.load %arg1[%c0_1, %c0_2, %c0_3, %c0_4] : memref<1x9x147x121xbf16, #tpu.memory_space<vmem>>, vector<1x1x147x121xbf16>
    %2 = vector.shape_cast %1 : vector<1x1x147x121xbf16> to vector<147x121xbf16>
    %cst = arith.constant dense<0.000000e+00> : vector<8x121xf32>
    %3 = tpu.matmul %0, %2, %cst {dimension_numbers = #tpu.dot_dimension_numbers<[1], [0], [0], [1], [0, 0, 1, 1], [], []>} : vector<8x147xbf16>, vector<147x121xbf16>, vector<8x121xf32> -> vector<8x121xf32>
    %c0_5 = arith.constant 0 : index
    %c1 = arith.constant 1 : index
    %c0_6 = arith.constant 0 : index
    %c0_7 = arith.constant 0 : index
    %4 = vector.load %arg1[%c0_5, %c1, %c0_6, %c0_7] : memref<1x9x147x121xbf16, #tpu.memory_space<vmem>>, vector<1x1x147x121xbf16>
    %5 = vector.shape_cast %4 : vector<1x1x147x121xbf16> to vector<147x121xbf16>
    %cst_8 = arith.constant dense<0.000000e+00> : vector<8x121xf32>
    %6 = tpu.matmul %0, %5, %cst_8 {dimension_numbers = #tpu.dot_dimension_numbers<[1], [0], [0], [1], [0, 0, 1, 1], [], []>} : vector<8x147xbf16>, vector<147x121xbf16>, vector<8x121xf32> -> vector<8x121xf32>
    %7 = arith.maximumf %3, %6 : vector<8x121xf32>
    %c0_9 = arith.constant 0 : index
    %c2 = arith.constant 2 : index
    %c0_10 = arith.constant 0 : index
    %c0_11 = arith.constant 0 : index
    %8 = vector.load %arg1[%c0_9, %c2, %c0_10, %c0_11] : memref<1x9x147x121xbf16, #tpu.memory_space<vmem>>, vector<1x1x147x121xbf16>
    %9 = vector.shape_cast %8 : vector<1x1x147x121xbf16> to vector<147x121xbf16>
    %cst_12 = arith.constant dense<0.000000e+00> : vector<8x121xf32>
    %10 = tpu.matmul %0, %9, %cst_12 {dimension_numbers = #tpu.dot_dimension_numbers<[1], [0], [0], [1], [0, 0, 1, 1], [], []>} : vector<8x147xbf16>, vector<147x121xbf16>, vector<8x121xf32> -> vector<8x121xf32>
    %11 = arith.maximumf %7, %10 : vector<8x121xf32>
    %c0_13 = arith.constant 0 : index
    %c3 = arith.constant 3 : index
    %c0_14 = arith.constant 0 : index
    %c0_15 = arith.constant 0 : index
    %12 = vector.load %arg1[%c0_13, %c3, %c0_14, %c0_15] : memref<1x9x147x121xbf16, #tpu.memory_space<vmem>>, vector<1x1x147x121xbf16>
    %13 = vector.shape_cast %12 : vector<1x1x147x121xbf16> to vector<147x121xbf16>
    %cst_16 = arith.constant dense<0.000000e+00> : vector<8x121xf32>
    %14 = tpu.matmul %0, %13, %cst_16 {dimension_numbers = #tpu.dot_dimension_numbers<[1], [0], [0], [1], [0, 0, 1, 1], [], []>} : vector<8x147xbf16>, vector<147x121xbf16>, vector<8x121xf32> -> vector<8x121xf32>
    %15 = arith.maximumf %11, %14 : vector<8x121xf32>
    %c0_17 = arith.constant 0 : index
    %c4 = arith.constant 4 : index
    %c0_18 = arith.constant 0 : index
    %c0_19 = arith.constant 0 : index
    %16 = vector.load %arg1[%c0_17, %c4, %c0_18, %c0_19] : memref<1x9x147x121xbf16, #tpu.memory_space<vmem>>, vector<1x1x147x121xbf16>
    %17 = vector.shape_cast %16 : vector<1x1x147x121xbf16> to vector<147x121xbf16>
    %cst_20 = arith.constant dense<0.000000e+00> : vector<8x121xf32>
    %18 = tpu.matmul %0, %17, %cst_20 {dimension_numbers = #tpu.dot_dimension_numbers<[1], [0], [0], [1], [0, 0, 1, 1], [], []>} : vector<8x147xbf16>, vector<147x121xbf16>, vector<8x121xf32> -> vector<8x121xf32>
    %19 = arith.maximumf %15, %18 : vector<8x121xf32>
    %c0_21 = arith.constant 0 : index
    %c5 = arith.constant 5 : index
    %c0_22 = arith.constant 0 : index
    %c0_23 = arith.constant 0 : index
    %20 = vector.load %arg1[%c0_21, %c5, %c0_22, %c0_23] : memref<1x9x147x121xbf16, #tpu.memory_space<vmem>>, vector<1x1x147x121xbf16>
    %21 = vector.shape_cast %20 : vector<1x1x147x121xbf16> to vector<147x121xbf16>
    %cst_24 = arith.constant dense<0.000000e+00> : vector<8x121xf32>
    %22 = tpu.matmul %0, %21, %cst_24 {dimension_numbers = #tpu.dot_dimension_numbers<[1], [0], [0], [1], [0, 0, 1, 1], [], []>} : vector<8x147xbf16>, vector<147x121xbf16>, vector<8x121xf32> -> vector<8x121xf32>
    %23 = arith.maximumf %19, %22 : vector<8x121xf32>
    %c0_25 = arith.constant 0 : index
    %c6 = arith.constant 6 : index
    %c0_26 = arith.constant 0 : index
    %c0_27 = arith.constant 0 : index
    %24 = vector.load %arg1[%c0_25, %c6, %c0_26, %c0_27] : memref<1x9x147x121xbf16, #tpu.memory_space<vmem>>, vector<1x1x147x121xbf16>
    %25 = vector.shape_cast %24 : vector<1x1x147x121xbf16> to vector<147x121xbf16>
    %cst_28 = arith.constant dense<0.000000e+00> : vector<8x121xf32>
    %26 = tpu.matmul %0, %25, %cst_28 {dimension_numbers = #tpu.dot_dimension_numbers<[1], [0], [0], [1], [0, 0, 1, 1], [], []>} : vector<8x147xbf16>, vector<147x121xbf16>, vector<8x121xf32> -> vector<8x121xf32>
    %27 = arith.maximumf %23, %26 : vector<8x121xf32>
    %c0_29 = arith.constant 0 : index
    %c7 = arith.constant 7 : index
    %c0_30 = arith.constant 0 : index
    %c0_31 = arith.constant 0 : index
    %28 = vector.load %arg1[%c0_29, %c7, %c0_30, %c0_31] : memref<1x9x147x121xbf16, #tpu.memory_space<vmem>>, vector<1x1x147x121xbf16>
    %29 = vector.shape_cast %28 : vector<1x1x147x121xbf16> to vector<147x121xbf16>
    %cst_32 = arith.constant dense<0.000000e+00> : vector<8x121xf32>
    %30 = tpu.matmul %0, %29, %cst_32 {dimension_numbers = #tpu.dot_dimension_numbers<[1], [0], [0], [1], [0, 0, 1, 1], [], []>} : vector<8x147xbf16>, vector<147x121xbf16>, vector<8x121xf32> -> vector<8x121xf32>
    %31 = arith.maximumf %27, %30 : vector<8x121xf32>
    %c0_33 = arith.constant 0 : index
    %c8 = arith.constant 8 : index
    %c0_34 = arith.constant 0 : index
    %c0_35 = arith.constant 0 : index
    %32 = vector.load %arg1[%c0_33, %c8, %c0_34, %c0_35] : memref<1x9x147x121xbf16, #tpu.memory_space<vmem>>, vector<1x1x147x121xbf16>
    %33 = vector.shape_cast %32 : vector<1x1x147x121xbf16> to vector<147x121xbf16>
    %cst_36 = arith.constant dense<0.000000e+00> : vector<8x121xf32>
    %34 = tpu.matmul %0, %33, %cst_36 {dimension_numbers = #tpu.dot_dimension_numbers<[1], [0], [0], [1], [0, 0, 1, 1], [], []>} : vector<8x147xbf16>, vector<147x121xbf16>, vector<8x121xf32> -> vector<8x121xf32>
    %35 = arith.maximumf %31, %34 : vector<8x121xf32>
    %c0_37 = arith.constant 0 : index
    %c0_38 = arith.constant 0 : index
    %36 = vector.load %arg3[%c0_37, %c0_38] : memref<8x1xf32, #tpu.memory_space<vmem>>, vector<8x1xf32>
    %37 = vector.broadcast %36 : vector<8x1xf32> to vector<8x121xf32>
    %38 = arith.addf %35, %37 : vector<8x121xf32>
    %cst_39 = arith.constant 0.000000e+00 : f32
    %39 = vector.broadcast %cst_39 : f32 to vector<8x121xf32>
    %40 = arith.maximumf %38, %39 : vector<8x121xf32>
    %c0_40 = arith.constant 0 : index
    %c0_41 = arith.constant 0 : index
    %41 = vector.load %arg5[%c0_40, %c0_41] : memref<1x128xf32, #tpu.memory_space<vmem>>, vector<1x128xf32>
    %42 = vector.extract_strided_slice %40 {offsets = [0, 0], sizes = [1, 121], strides = [1, 1]} : vector<8x121xf32> to vector<1x121xf32>
    %43 = arith.truncf %42 : vector<1x121xf32> to vector<1x121xbf16>
    %c0_42 = arith.constant 0 : index
    %c0_43 = arith.constant 0 : index
    %c0_44 = arith.constant 0 : index
    %44 = vector.load %arg4[%c0_42, %c0_43, %c0_44] : memref<8x121x128xbf16, #tpu.memory_space<vmem>>, vector<1x121x128xbf16>
    %45 = vector.shape_cast %44 : vector<1x121x128xbf16> to vector<121x128xbf16>
    %cst_45 = arith.constant dense<0.000000e+00> : vector<1x128xf32>
    %46 = tpu.matmul %43, %45, %cst_45 {dimension_numbers = #tpu.dot_dimension_numbers<[1], [0], [0], [1], [0, 0, 1, 1], [], []>} : vector<1x121xbf16>, vector<121x128xbf16>, vector<1x128xf32> -> vector<1x128xf32>
    %47 = arith.addf %41, %46 : vector<1x128xf32>
    %48 = vector.extract_strided_slice %40 {offsets = [1, 0], sizes = [1, 121], strides = [1, 1]} : vector<8x121xf32> to vector<1x121xf32>
    %49 = arith.truncf %48 : vector<1x121xf32> to vector<1x121xbf16>
    %c1_46 = arith.constant 1 : index
    %c0_47 = arith.constant 0 : index
    %c0_48 = arith.constant 0 : index
    %50 = vector.load %arg4[%c1_46, %c0_47, %c0_48] : memref<8x121x128xbf16, #tpu.memory_space<vmem>>, vector<1x121x128xbf16>
    %51 = vector.shape_cast %50 : vector<1x121x128xbf16> to vector<121x128xbf16>
    %cst_49 = arith.constant dense<0.000000e+00> : vector<1x128xf32>
    %52 = tpu.matmul %49, %51, %cst_49 {dimension_numbers = #tpu.dot_dimension_numbers<[1], [0], [0], [1], [0, 0, 1, 1], [], []>} : vector<1x121xbf16>, vector<121x128xbf16>, vector<1x128xf32> -> vector<1x128xf32>
    %53 = arith.addf %47, %52 : vector<1x128xf32>
    %54 = vector.extract_strided_slice %40 {offsets = [2, 0], sizes = [1, 121], strides = [1, 1]} : vector<8x121xf32> to vector<1x121xf32>
    %55 = arith.truncf %54 : vector<1x121xf32> to vector<1x121xbf16>
    %c2_50 = arith.constant 2 : index
    %c0_51 = arith.constant 0 : index
    %c0_52 = arith.constant 0 : index
    %56 = vector.load %arg4[%c2_50, %c0_51, %c0_52] : memref<8x121x128xbf16, #tpu.memory_space<vmem>>, vector<1x121x128xbf16>
    %57 = vector.shape_cast %56 : vector<1x121x128xbf16> to vector<121x128xbf16>
    %cst_53 = arith.constant dense<0.000000e+00> : vector<1x128xf32>
    %58 = tpu.matmul %55, %57, %cst_53 {dimension_numbers = #tpu.dot_dimension_numbers<[1], [0], [0], [1], [0, 0, 1, 1], [], []>} : vector<1x121xbf16>, vector<121x128xbf16>, vector<1x128xf32> -> vector<1x128xf32>
    %59 = arith.addf %53, %58 : vector<1x128xf32>
    %60 = vector.extract_strided_slice %40 {offsets = [3, 0], sizes = [1, 121], strides = [1, 1]} : vector<8x121xf32> to vector<1x121xf32>
    %61 = arith.truncf %60 : vector<1x121xf32> to vector<1x121xbf16>
    %c3_54 = arith.constant 3 : index
    %c0_55 = arith.constant 0 : index
    %c0_56 = arith.constant 0 : index
    %62 = vector.load %arg4[%c3_54, %c0_55, %c0_56] : memref<8x121x128xbf16, #tpu.memory_space<vmem>>, vector<1x121x128xbf16>
    %63 = vector.shape_cast %62 : vector<1x121x128xbf16> to vector<121x128xbf16>
    %cst_57 = arith.constant dense<0.000000e+00> : vector<1x128xf32>
    %64 = tpu.matmul %61, %63, %cst_57 {dimension_numbers = #tpu.dot_dimension_numbers<[1], [0], [0], [1], [0, 0, 1, 1], [], []>} : vector<1x121xbf16>, vector<121x128xbf16>, vector<1x128xf32> -> vector<1x128xf32>
    %65 = arith.addf %59, %64 : vector<1x128xf32>
    %66 = vector.extract_strided_slice %40 {offsets = [4, 0], sizes = [1, 121], strides = [1, 1]} : vector<8x121xf32> to vector<1x121xf32>
    %67 = arith.truncf %66 : vector<1x121xf32> to vector<1x121xbf16>
    %c4_58 = arith.constant 4 : index
    %c0_59 = arith.constant 0 : index
    %c0_60 = arith.constant 0 : index
    %68 = vector.load %arg4[%c4_58, %c0_59, %c0_60] : memref<8x121x128xbf16, #tpu.memory_space<vmem>>, vector<1x121x128xbf16>
    %69 = vector.shape_cast %68 : vector<1x121x128xbf16> to vector<121x128xbf16>
    %cst_61 = arith.constant dense<0.000000e+00> : vector<1x128xf32>
    %70 = tpu.matmul %67, %69, %cst_61 {dimension_numbers = #tpu.dot_dimension_numbers<[1], [0], [0], [1], [0, 0, 1, 1], [], []>} : vector<1x121xbf16>, vector<121x128xbf16>, vector<1x128xf32> -> vector<1x128xf32>
    %71 = arith.addf %65, %70 : vector<1x128xf32>
    %72 = vector.extract_strided_slice %40 {offsets = [5, 0], sizes = [1, 121], strides = [1, 1]} : vector<8x121xf32> to vector<1x121xf32>
    %73 = arith.truncf %72 : vector<1x121xf32> to vector<1x121xbf16>
    %c5_62 = arith.constant 5 : index
    %c0_63 = arith.constant 0 : index
    %c0_64 = arith.constant 0 : index
    %74 = vector.load %arg4[%c5_62, %c0_63, %c0_64] : memref<8x121x128xbf16, #tpu.memory_space<vmem>>, vector<1x121x128xbf16>
    %75 = vector.shape_cast %74 : vector<1x121x128xbf16> to vector<121x128xbf16>
    %cst_65 = arith.constant dense<0.000000e+00> : vector<1x128xf32>
    %76 = tpu.matmul %73, %75, %cst_65 {dimension_numbers = #tpu.dot_dimension_numbers<[1], [0], [0], [1], [0, 0, 1, 1], [], []>} : vector<1x121xbf16>, vector<121x128xbf16>, vector<1x128xf32> -> vector<1x128xf32>
    %77 = arith.addf %71, %76 : vector<1x128xf32>
    %78 = vector.extract_strided_slice %40 {offsets = [6, 0], sizes = [1, 121], strides = [1, 1]} : vector<8x121xf32> to vector<1x121xf32>
    %79 = arith.truncf %78 : vector<1x121xf32> to vector<1x121xbf16>
    %c6_66 = arith.constant 6 : index
    %c0_67 = arith.constant 0 : index
    %c0_68 = arith.constant 0 : index
    %80 = vector.load %arg4[%c6_66, %c0_67, %c0_68] : memref<8x121x128xbf16, #tpu.memory_space<vmem>>, vector<1x121x128xbf16>
    %81 = vector.shape_cast %80 : vector<1x121x128xbf16> to vector<121x128xbf16>
    %cst_69 = arith.constant dense<0.000000e+00> : vector<1x128xf32>
    %82 = tpu.matmul %79, %81, %cst_69 {dimension_numbers = #tpu.dot_dimension_numbers<[1], [0], [0], [1], [0, 0, 1, 1], [], []>} : vector<1x121xbf16>, vector<121x128xbf16>, vector<1x128xf32> -> vector<1x128xf32>
    %83 = arith.addf %77, %82 : vector<1x128xf32>
    %84 = vector.extract_strided_slice %40 {offsets = [7, 0], sizes = [1, 121], strides = [1, 1]} : vector<8x121xf32> to vector<1x121xf32>
    %85 = arith.truncf %84 : vector<1x121xf32> to vector<1x121xbf16>
    %c7_70 = arith.constant 7 : index
    %c0_71 = arith.constant 0 : index
    %c0_72 = arith.constant 0 : index
    %86 = vector.load %arg4[%c7_70, %c0_71, %c0_72] : memref<8x121x128xbf16, #tpu.memory_space<vmem>>, vector<1x121x128xbf16>
    %87 = vector.shape_cast %86 : vector<1x121x128xbf16> to vector<121x128xbf16>
    %cst_73 = arith.constant dense<0.000000e+00> : vector<1x128xf32>
    %88 = tpu.matmul %85, %87, %cst_73 {dimension_numbers = #tpu.dot_dimension_numbers<[1], [0], [0], [1], [0, 0, 1, 1], [], []>} : vector<1x121xbf16>, vector<121x128xbf16>, vector<1x128xf32> -> vector<1x128xf32>
    %89 = arith.addf %83, %88 : vector<1x128xf32>
    %cst_74 = arith.constant 0.000000e+00 : f32
    %90 = vector.broadcast %cst_74 : f32 to vector<1x128xf32>
    %91 = arith.maximumf %89, %90 : vector<1x128xf32>
    %c0_75 = arith.constant 0 : index
    %c0_76 = arith.constant 0 : index
    %92 = vector.load %arg6[%c0_75, %c0_76] : memref<1x128xf32, #tpu.memory_space<vmem>>, vector<1x128xf32>
    %93 = arith.mulf %91, %92 : vector<1x128xf32>
    %cst_77 = arith.constant dense<0.000000e+00> : vector<1xf32>
    %94 = vector.multi_reduction <add>, %93, %cst_77 [1] : vector<1x128xf32> to vector<1xf32>
    %95 = vector.shape_cast %94 : vector<1xf32> to vector<1x1xf32>
    %c0_78 = arith.constant 0 : index
    %c0_79 = arith.constant 0 : index
    %96 = vector.load %arg7[%c0_78, %c0_79] : memref<1x1xf32, #tpu.memory_space<vmem>>, vector<1x1xf32>
    %97 = arith.addf %95, %96 : vector<1x1xf32>
    %98 = vector.shape_cast %97 : vector<1x1xf32> to vector<1x1x1xf32>
    %99 = vector.shape_cast %98 : vector<1x1x1xf32> to vector<1x1x1xf32>
    %100 = vector.broadcast %99 : vector<1x1x1xf32> to vector<1x8x128xf32>
    %c0_80 = arith.constant 0 : index
    %c0_81 = arith.constant 0 : index
    %c0_82 = arith.constant 0 : index
    %101 = vector.load %arg8[%c0_80, %c0_81, %c0_82] : memref<1x8x128xf32, #tpu.memory_space<vmem>>, vector<1x8x128xf32>
    tpu.vector_store %arg8[%c0_80, %c0_81, %c0_82], %100 {strides = array<i32>} : memref<1x8x128xf32, #tpu.memory_space<vmem>>, vector<1x8x128xf32>,
    return
  }
  func.func @transform_0(%arg0: i32) -> (i32, i32, i32, i32) {
    %c0_i32 = arith.constant 0 : i32
    %c0_i32_0 = arith.constant 0 : i32
    %c0_i32_1 = arith.constant 0 : i32
    %c0_i32_2 = arith.constant 0 : i32
    return %arg0, %c0_i32, %c0_i32_0, %c0_i32_1 : i32, i32, i32, i32
  }
  func.func @transform_1(%arg0: i32) -> (i32, i32) {
    %c0_i32 = arith.constant 0 : i32
    %c0_i32_0 = arith.constant 0 : i32
    %c0_i32_1 = arith.constant 0 : i32
    return %c0_i32, %c0_i32_0 : i32, i32
  }
  func.func @transform_2(%arg0: i32) -> (i32, i32) {
    %c0_i32 = arith.constant 0 : i32
    %c0_i32_0 = arith.constant 0 : i32
    %c0_i32_1 = arith.constant 0 : i32
    return %c0_i32, %c0_i32_0 : i32, i32
  }
  func.func @transform_3(%arg0: i32) -> (i32, i32, i32) {
    %c0_i32 = arith.constant 0 : i32
    %c0_i32_0 = arith.constant 0 : i32
    %c0_i32_1 = arith.constant 0 : i32
    %c0_i32_2 = arith.constant 0 : i32
    return %c0_i32, %c0_i32_0, %c0_i32_1 : i32, i32, i32
  }
  func.func @transform_4(%arg0: i32) -> (i32, i32) {
    %c0_i32 = arith.constant 0 : i32
    %c0_i32_0 = arith.constant 0 : i32
    %c0_i32_1 = arith.constant 0 : i32
    return %c0_i32, %c0_i32_0 : i32, i32
  }
  func.func @transform_5(%arg0: i32) -> (i32, i32) {
    %c0_i32 = arith.constant 0 : i32
    %c0_i32_0 = arith.constant 0 : i32
    %c0_i32_1 = arith.constant 0 : i32
    return %c0_i32, %c0_i32_0 : i32, i32
  }
  func.func @transform_6(%arg0: i32) -> (i32, i32) {
    %c0_i32 = arith.constant 0 : i32
    %c0_i32_0 = arith.constant 0 : i32
    %c0_i32_1 = arith.constant 0 : i32
    return %c0_i32, %c0_i32_0 : i32, i32
  }
  func.func @transform_7(%arg0: i32) -> (i32, i32, i32) {
    %c0_i32 = arith.constant 0 : i32
    %c0_i32_0 = arith.constant 0 : i32
    %c0_i32_1 = arith.constant 0 : i32
    return %arg0, %c0_i32, %c0_i32_0 : i32, i32, i32
  }
}

</mosaic_0001>

<bundles_post_ra>
// kernel: conv1net_forward.1
= control target key start
LH: loop header
LB: loop body
LE: loop exit
PB: predicated region body
PF: predicated region fallthrough
CT: control target
= control target key end

     0   :  { %s3099_s26 = smov 0   ;;  %s3541_s0 = inlined_call_operand.vmem [shape: bf16[2,9,147,121], index: 0, kind: input, shape index: {}]   ;;  %s3542_s1 = inlined_call_operand.vmem [shape: bf16[8,147], index: 1, kind: input, shape index: {}]   ;;  %s3543_s2 = inlined_call_operand.vmem [shape: f32[8,1], index: 2, kind: input, shape index: {}]   ;;  %s3544_s3 = inlined_call_operand.vmem [shape: bf16[8,121,128], index: 3, kind: input, shape index: {}]   ;;  %s3545_s4 = inlined_call_operand.vmem [shape: f32[1,128], index: 4, kind: input, shape index: {}]   ;;  %s3546_s5 = inlined_call_operand.vmem [shape: f32[1,128], index: 5, kind: input, shape index: {}]   ;;  %s3547_s6 = inlined_call_operand.<no memory space> [shape: f32[1,1], index: 6, kind: input, shape index: {}]   ;;  %s3548_s7 = inlined_call_operand.vmem [shape: f32[2,8,128], index: 7, kind: output, shape index: {}]  }
   0x1   :  { %v12_v0 = vstv %s3547_s6 }
   0x2   :  { %13 = vst [vmem:[#allocation2] sm:$0x1] %v12_v0 }
   0x3 LB: > { %s2017_s27 = sadd.s32 4294967295, %s3052_s26   ;;  %p2021_p0 = scmp.ge.s32.totalorder %s3052_s26, 1  ;;  %s3052_s26 = sphi %s3099_s26, %s19_s26  }
   0x4   : > { %p239_p1 = scmp.lt.s32.totalorder %s3052_s26, 3 }
   0x6   : > { %p240_p2 = pnand %p2021_p0, %p239_p1 }
   0x7   : > { %p270_p3 = scmp.lt.s32.totalorder (!%p240_p2), %s2017_s27, 1 }
   0x8   : > { %243 = sbr.rel (%p240_p2) target bundleno = 592 (0x250), region = 48 }
   0xd   : > { %s3550_s27 = smov (!%p270_p3, %s2017_s27), 1  ;;  %vm367_vm0 = vcmask 1040384   ;;  %vm368_vm1 = vcmask 1041408   ;;  %v3054_v1 = vmov 65535   ;;  %v3129_v16 = vld [vmem:[%s3542_s1] sm:$0xff]  ;;  %vm363_vm2 = vcmask 154624  }
   0xe   : > { %s3032_s6 = smul.u32 684, %s3550_s27  ;;  %v369_v2 = vsel %vm367_vm0, 4294967295, %v3054_v1  ;;  %v302_v23 = vunpack.c.h.b16 %v3129_v16  ;;  %v301_v46 = vunpack.c.l.b16 %v3129_v16  ;;  %vm1333_vm3 = vcmask 1043456   ;;  %s2023_s29 = sshll.u32 %s3550_s27, 3 }
   0xf   : > { %v3121_v8 = vsel %vm368_vm1, %v369_v2, 0  ;;  %vm1334_vm4 = vcmask 1044480   ;;  %vm1329_vm5 = vcmask 990208   ;;  %s278_s9 = scalar_lea.vmem %s3548_s7, %s2023_s29 }
  0x10   : > { %s3113_s30 = scalar_lea.vmem %s3541_s0, %s3032_s6  ;;  %v3142_v29 = vpack.c.b16 %v302_v23, %v302_v23  ;;  %v3170_v54 = vpack.c.b16 %v301_v46, %v301_v46 }
  0x11   : > { %v2903_v3 = vld [vmem:[%s3113_s30 + $0x84] sm:$0xff]  ;;  %v2894_v4 = vld [vmem:[%s3113_s30 + $0x38] sm:$0xff]  ;;  %v2079_v7 = vld [vmem:[%s3113_s30 + $0x94] sm:$0x3] }
  0x12   : > { %v299_v5 = vld [vmem:[%s3113_s30 + $0x48] sm:$0x3]  ;;  %480 = vmatpush.bf16.msra.mxu2 %v2903_v3  ;;  %374 = vmatpush.bf16.msra.mxu0 %v2894_v4  ;;  %v2902_v9 = vld [vmem:[%s3113_s30 + $0x7c] sm:$0xff]  ;;  %v457_v10 = vunpack.c.l.b16 %v2079_v7  ;;  %v2893_v11 = vld [vmem:[%s3113_s30 + $0x30] sm:$0xff] }
  0x13   : > { %v343_v6 = vunpack.c.l.b16 %v299_v5  ;;  %v2135_v13 = vld [vmem:[%s3113_s30 + $0xe0] sm:$0x3]  ;;  %v2901_v19 = vld [vmem:[%s3113_s30 + $0x74] sm:$0xff]  ;;  %v2892_v21 = vld [vmem:[%s3113_s30 + $0x28] sm:$0xff] }
  0x14   : > { %v467_v14 = vpack.c.b16 %v457_v10, %v457_v10  ;;  %v564_v15 = vunpack.c.l.b16 %v2135_v13  ;;  %v2895_v22 = vld [vmem:[%s3113_s30 + $0x40] sm:$0xff]  ;;  %v2904_v24 = vld [vmem:[%s3113_s30 + $0x8c] sm:$0xff]  ;;  %v2913_v31 = vld [vmem:[%s3113_s30 + $0xd8] sm:$0xff] }
  0x15   : > { %v353_v12 = vpack.c.b16 %v343_v6, %v343_v6  ;;  %v2912_v25 = vld [vmem:[%s3113_s30 + $0xd0] sm:$0xff]  ;;  %v2891_v28 = vld [vmem:[%s3113_s30 + $0x20] sm:$0xff]  ;;  %v2911_v30 = vld [vmem:[%s3113_s30 + $0xc8] sm:$0xff] }
  0x16   : > { %481 = vmatpush.bf16.msra.mxu2 %v2902_v9  ;;  %v478_v18 = vand.u32 %v467_v14, %v3121_v8  ;;  %375 = vmatpush.bf16.msra.mxu0 %v2893_v11  ;;  %v574_v20 = vpack.c.b16 %v564_v15, %v564_v15  ;;  %v2900_v27 = vld [vmem:[%s3113_s30 + $0x6c] sm:$0xff]  ;;  %v2921_v32 = vld [vmem:[%s3113_s30 + $0x11c] sm:$0xff]  ;;  %v2899_v33 = vld [vmem:[%s3113_s30 + $0x64] sm:$0xff] }
  0x17   : > { %v372_v17 = vand.u32 %v3121_v8, %v353_v12  ;;  %v2890_v34 = vld [vmem:[%s3113_s30 + $0x18] sm:$0xff]  ;;  %v2910_v35 = vld [vmem:[%s3113_s30 + $0xc0] sm:$0xff]  ;;  %v2191_v38 = vld [vmem:[%s3113_s30 + $0x12c] sm:$0x3] }
  0x18   : > { %499 = vmatpush.bf16.msra.mxu3 %v478_v18  ;;  %v585_v26 = vand.u32 %v574_v20, %v3121_v8  ;;  %v2920_v36 = vld [vmem:[%s3113_s30 + $0x114] sm:$0xff]  ;;  %v2898_v37 = vld [vmem:[%s3113_s30 + $0x5c] sm:$0xff]  ;;  %v671_v41 = vunpack.c.l.b16 %v2191_v38  ;;  %v2919_v42 = vld [vmem:[%s3113_s30 + $0x10c] sm:$0xff] }
  0x19   : > { %393 = vmatpush.bf16.msra.mxu1 %v372_v17  ;;  %v2889_v39 = vld [vmem:[%s3113_s30 + $0x10] sm:$0xff]  ;;  %v2909_v40 = vld [vmem:[%s3113_s30 + $0xb8] sm:$0xff]  ;;  %v2888_v44 = vld [vmem:[%s3113_s30 + $0x8] sm:$0xff] }
  0x1a   : > { %482 = vmatpush.bf16.msra.mxu2 %v2901_v19  ;;  %376 = vmatpush.bf16.msra.mxu0 %v2892_v21  ;;  %v2897_v43 = vld [vmem:[%s3113_s30 + $0x54] sm:$0xff]  ;;  %v681_v47 = vpack.c.b16 %v671_v41, %v671_v41  ;;  %v2918_v48 = vld [vmem:[%s3113_s30 + $0x104] sm:$0xff]  ;;  %v2896_v49 = vld [vmem:[%s3113_s30 + $0x4c] sm:$0xff] }
  0x1b   : > { %v2908_v45 = vld [vmem:[%s3113_s30 + $0xb0] sm:$0xff]  ;;  %v2247_v50 = vld [vmem:[%s3113_s30 + $0x178] sm:$0x3]  ;;  %v2930_v51 = vld [vmem:[%s3113_s30 + $0x168] sm:$0xff] }
  0x1c   : > { %500 = vmatpush.bf16.msra.mxu3 %v2904_v24  ;;  %v2907_v52 = vld [vmem:[%s3113_s30 + $0xa8] sm:$0xff]  ;;  %v2887_v53 = vld [vmem:[%s3113_s30] sm:$0xff]  ;;  %v692_v55 = vand.u32 %v681_v47, %v3121_v8  ;;  %v778_v56 = vunpack.c.l.b16 %v2247_v50  ;;  %v2916_v63 = vld [vmem:[%s3113_s30 + $0xf4] sm:$0xff] }
  0x1d   : > { %394 = vmatpush.bf16.msra.mxu1 %v2895_v22  ;;  %v2917_v57 = vld [vmem:[%s3113_s30 + $0xfc] sm:$0xff]  ;;  %v2922_v60 = vld [vmem:[%s3113_s30 + $0x124] sm:$0xff]  ;;  %v2939_v0 = vld [vmem:[%s3113_s30 + $0x1b4] sm:$0xff] }
  0x1e   : > { %483 = vmatpush.bf16.msra.mxu2 %v2900_v27  ;;  %377 = vmatpush.bf16.msra.mxu0 %v2891_v28  ;;  %v2929_v58 = vld [vmem:[%s3113_s30 + $0x160] sm:$0xff]  ;;  %v788_v61 = vpack.c.b16 %v778_v56, %v778_v56  ;;  %v2928_v2 = vld [vmem:[%s3113_s30 + $0x158] sm:$0xff]  ;;  %v2915_v6 = vld [vmem:[%s3113_s30 + $0xec] sm:$0xff] }
  0x1f   : > { %2116 = vmatmul.msk.bf16.vlgmr.msra.gmra.mxu3 %vm363_vm2, %v3142_v29  ;;  %v2906_v59 = vld [vmem:[%s3113_s30 + $0xa0] sm:$0xff]  ;;  %v2905_v3 = vld [vmem:[%s3113_s30 + $0x98] sm:$0xff]  ;;  %v2938_v7 = vld [vmem:[%s3113_s30 + $0x1ac] sm:$0xff] }
  0x20   : > { %606 = vmatpush.bf16.msrb.mxu3 %v585_v26  ;;  %2060 = vmatmul.msk.bf16.vlgmr.msra.gmra.mxu1 %vm363_vm2, %v3142_v29  ;;  %v2303_v62 = vld [vmem:[%s3113_s30 + $0x1c4] sm:$0x3]  ;;  %v799_v5 = vand.u32 %v788_v61, %v3121_v8  ;;  %v2927_v9 = vld [vmem:[%s3113_s30 + $0x150] sm:$0xff]  ;;  %v2926_v15 = vld [vmem:[%s3113_s30 + $0x148] sm:$0xff] }
  0x21   : > { %587 = vmatpush.bf16.msrb.mxu1 %v2912_v25  ;;  %v885_v4 = vunpack.c.l.b16 %v2303_v62  ;;  %v2931_v11 = vld [vmem:[%s3113_s30 + $0x170] sm:$0xff]  ;;  %v2914_v12 = vld [vmem:[%s3113_s30 + $0xe4] sm:$0xff]  ;;  %v2936_v17 = vld [vmem:[%s3113_s30 + $0x19c] sm:$0xff] }
  0x22   : > { %484 = vmatpush.bf16.msra.mxu2 %v2899_v33  ;;  %378 = vmatpush.bf16.msra.mxu0 %v2890_v34  ;;  %v2937_v13 = vld [vmem:[%s3113_s30 + $0x1a4] sm:$0xff]  ;;  %v2359_v18 = vld [vmem:[%s3113_s30 + $0x210] sm:$0x3]  ;;  %v2947_v19 = vld [vmem:[%s3113_s30 + $0x1f8] sm:$0xff] }
  0x23   : > { %v895_v10 = vpack.c.b16 %v885_v4, %v885_v4  ;;  %v2948_v14 = vld [vmem:[%s3113_s30 + $0x200] sm:$0xff]  ;;  %v2471_v22 = vld [vmem:[%s3113_s30 + $0x2a8] sm:$0x3]  ;;  %v992_v23 = vunpack.c.l.b16 %v2359_v18  ;;  %v2935_v25 = vld [vmem:[%s3113_s30 + $0x194] sm:$0xff] }
  0x24   : > { %607 = vmatpush.bf16.msrb.mxu3 %v2913_v31  ;;  %v2925_v20 = vld [vmem:[%s3113_s30 + $0x140] sm:$0xff]  ;;  %v1206_v24 = vunpack.c.l.b16 %v2471_v22  ;;  %v2946_v26 = vld [vmem:[%s3113_s30 + $0x1f0] sm:$0xff]  ;;  %v2924_v27 = vld [vmem:[%s3113_s30 + $0x138] sm:$0xff] }
  0x25   : > { %588 = vmatpush.bf16.msrb.mxu1 %v2911_v30  ;;  %v906_v16 = vand.u32 %v895_v10, %v3121_v8  ;;  %v2940_v21 = vld [vmem:[%s3113_s30 + $0x1bc] sm:$0xff]  ;;  %v1002_v31 = vpack.c.b16 %v992_v23, %v992_v23  ;;  %v2934_v33 = vld [vmem:[%s3113_s30 + $0x18c] sm:$0xff]  ;;  %v2539_v10 = vld [vmem:[%s3544_s3 + $0x38] sm:$0xf] }
  0x26   : > { %485 = vmatpush.bf16.msra.mxu2 %v2898_v37  ;;  %379 = vmatpush.bf16.msra.mxu0 %v2889_v39  ;;  %v3207_v28 = vpack.c.b16 %v1206_v24, %v1206_v24  ;;  %v2415_v30 = vld [vmem:[%s3113_s30 + $0x25c] sm:$0x3]  ;;  %v2945_v34 = vld [vmem:[%s3113_s30 + $0x1e8] sm:$0xff]  ;;  %v1256_v50 = vld [vmem:[%s3543_s2] sm:$0xff] }
  0x27   : > { %v2957_v37 = vld [vmem:[%s3113_s30 + $0x24c] sm:$0xff]  ;;  %v1013_v38 = vand.u32 %v1002_v31, %v3121_v8  ;;  %v2933_v39 = vld [vmem:[%s3113_s30 + $0x184] sm:$0xff]  ;;  %v2943_v46 = vld [vmem:[%s3113_s30 + $0x1d8] sm:$0xff] }
  0x28   : > { %694 = vmatpush.bf16.msra.mxu3 %v2921_v32  ;;  %v1227_v32 = vand.u32 %v3207_v28, %v3121_v8  ;;  %v2941_v56 = vld [vmem:[%s3113_s30 + $0x1c8] sm:$0xff]  ;;  %v2962_v61 = vld [vmem:[%s3113_s30 + $0x278] sm:$0xff]  ;;  %v2974_v28 = vld [vmem:[%s3544_s3 + $0x30] sm:$0xff] }
  0x29   : > { %589 = vmatpush.bf16.msrb.mxu1 %v2910_v35  ;;  %v1099_v35 = vunpack.c.l.b16 %v2415_v30  ;;  %v2951_v62 = vld [vmem:[%s3113_s30 + $0x21c] sm:$0xff] }
  0x2a   : > { %486 = vmatpush.bf16.msra.mxu2 %v2897_v43  ;;  %380 = vmatpush.bf16.msra.mxu0 %v2888_v44  ;;  %v2949_v43 = vld [vmem:[%s3113_s30 + $0x208] sm:$0xff]  ;;  %v2966_v44 = vld [vmem:[%s3113_s30 + $0x298] sm:$0xff] }
  0x2b   : > { %v1109_v41 = vpack.c.b16 %v1099_v35, %v1099_v35 }
  0x2c   : > { %695 = vmatpush.bf16.msra.mxu3 %v2920_v36  ;;  %v2923_v36 = vld [vmem:[%s3113_s30 + $0x130] sm:$0xff] }
  0x2d   : > { %590 = vmatpush.bf16.msrb.mxu1 %v2909_v40  ;;  %v2944_v40 = vld [vmem:[%s3113_s30 + $0x1e0] sm:$0xff]  ;;  %v1120_v47 = vand.u32 %v1109_v41, %v3121_v8  ;;  %v2954_v8 = vld [vmem:[%s3113_s30 + $0x234] sm:$0xff] }
  0x2e   : > { %487 = vmatpush.bf16.msra.mxu2 %v2896_v49  ;;  %381 = vmatpush.bf16.msra.mxu0 %v2887_v53  ;;  %v2965_v49 = vld [vmem:[%s3113_s30 + $0x290] sm:$0xff]  ;;  %v3055_v53 = vmov 0   ;;  %v2972_v41 = vld [vmem:[%s3544_s3 + $0x20] sm:$0xff] }
  0x2f   : > { %2172 = vmatmul.msk.bf16.vlgmr.msrb.gmra.mxu3 %vm363_vm2, %v3142_v29  ;;  %3045 = vset.pattern.permute.xlu0 %v3055_v53  ;;  %v2995_v53 = vld [vmem:[%s3544_s3 + $0xd8] sm:$0xff] }
  0x30   : > { %696 = vmatpush.bf16.msra.mxu3 %v2919_v42  ;;  %v2956_v42 = vld [vmem:[%s3113_s30 + $0x244] sm:$0xff]  ;;  %1259 = vperm.xlu0 %3045, %v1256_v50   ;;  %v2979_v50 = vld [vmem:[%s3544_s3 + $0x58] sm:$0xff] }
  0x31   : > { %591 = vmatpush.bf16.msrb.mxu1 %v2908_v45  ;;  %488 = vmatmul.bf16.vlgmr.msra.gmra.mxu2 %v3170_v54  ;;  %v2932_v45 = vld [vmem:[%s3113_s30 + $0x17c] sm:$0xff] }
  0x32   : > { %801 = vmatpush.bf16.msrb.mxu2 %v2930_v51  ;;  %713 = vmatpush.bf16.msrb.mxu0 %v692_v55  ;;  %v2942_v51 = vld [vmem:[%s3113_s30 + $0x1d0] sm:$0xff]  ;;  %v2964_v55 = vld [vmem:[%s3113_s30 + $0x288] sm:$0xff] }
  0x33   : > { %382 = vmatmul.bf16.vlgmr.msra.gmra.mxu0 %v3170_v54 }
  0x34   : > { %697 = vmatpush.bf16.msra.mxu3 %v2918_v48  ;;  %v2955_v48 = vld [vmem:[%s3113_s30 + $0x23c] sm:$0xff] }
  0x35   : > { %592 = vmatpush.bf16.msrb.mxu1 %v2907_v52  ;;  %v2958_v52 = vld [vmem:[%s3113_s30 + $0x254] sm:$0xff] }
  0x36   : > { %802 = vmatpush.bf16.msrb.mxu2 %v2929_v58  ;;  %714 = vmatpush.bf16.msrb.mxu0 %v2922_v60  ;;  %v2963_v58 = vld [vmem:[%s3113_s30 + $0x280] sm:$0xff] }
  0x37   : > { %v2967_v60 = vld [vmem:[%s3113_s30 + $0x2a0] sm:$0xff] }
  0x38   : > { %698 = vmatpush.bf16.msra.mxu3 %v2917_v57  ;;  %v2953_v57 = vld [vmem:[%s3113_s30 + $0x22c] sm:$0xff] }
  0x39   : > { %593 = vmatpush.bf16.msrb.mxu1 %v2906_v59  ;;  %v2952_v59 = vld [vmem:[%s3113_s30 + $0x224] sm:$0xff] }
  0x3a   : > { %908 = vmatpush.bf16.msra.mxu0 %v2939_v0  ;;  %803 = vmatpush.bf16.msrb.mxu2 %v2928_v2  ;;  %v2950_v0 = vld [vmem:[%s3113_s30 + $0x214] sm:$0xff]  ;;  %v2960_v2 = vld [vmem:[%s3113_s30 + $0x268] sm:$0xff] }
  0x3c   : > { %699 = vmatpush.bf16.msra.mxu3 %v2916_v63  ;;  %v2961_v63 = vld [vmem:[%s3113_s30 + $0x270] sm:$0xff] }
  0x3d   : > { %594 = vmatpush.bf16.msrb.mxu1 %v2905_v3  ;;  %v2959_v3 = vld [vmem:[%s3113_s30 + $0x260] sm:$0xff] }
  0x3e   : > { %909 = vmatpush.bf16.msra.mxu0 %v2938_v7  ;;  %804 = vmatpush.bf16.msrb.mxu2 %v2927_v9  ;;  %v1335_v9 = vsel %vm1333_vm3, 4294967295, %v3054_v1  ;;  %v2983_v1 = vld [vmem:[%s3544_s3 + $0x78] sm:$0x10] }
  0x40   : > { %700 = vmatpush.bf16.msra.mxu3 %v2915_v6  ;;  %595 = vmatmul.bf16.vlgmr.msrb.gmra.mxu1 %v3170_v54 }
  0x41   : > { %820 = vmatpush.bf16.msra.mxu1 %v799_v5 }
  0x42   : > { %910 = vmatpush.bf16.msra.mxu0 %v2937_v13  ;;  %805 = vmatpush.bf16.msrb.mxu2 %v2926_v15  ;;  %v3269_v13 = vsel %vm1334_vm4, %v1335_v9, 0  ;;  %v2833_v9 = vld [vmem:[%s3544_s3 + $0x1b8] sm:$0xf] }
  0x43   : > { %2228 = vmatmul.msk.bf16.vlgmr.msrb.gmra.mxu0 %vm363_vm2, %v3142_v29 }
  0x44   : > { %701 = vmatpush.bf16.msra.mxu3 %v2914_v12 }
  0x45   : > { %821 = vmatpush.bf16.msra.mxu1 %v2931_v11  ;;  %v2975_v11 = vld [vmem:[%s3544_s3 + $0x38] sm:$0x10] }
  0x46   : > { %911 = vmatpush.bf16.msra.mxu0 %v2936_v17  ;;  %806 = vmatpush.bf16.msrb.mxu2 %v2925_v20  ;;  %v2540_v12 = vor.u32 %v2975_v11, %v2539_v10  ;;  %v2991_v17 = vld [vmem:[%s3544_s3 + $0xb8] sm:$0x10]  ;;  %v2686_v20 = vld [vmem:[%s3544_s3 + $0xf8] sm:$0xf] }
  0x47   : > { %702 = vmatmul.bf16.vlgmr.msra.gmra.mxu3 %v3170_v54  ;;  %v3023_v11 = vld [vmem:[%s3544_s3 + $0x1b8] sm:$0x10] }
  0x48   : > { %1015 = vmatpush.bf16.msrb.mxu3 %v2948_v14  ;;  %v1338_v14 = vand.u32 %v2540_v12, %v3269_v13 }
  0x49   : > { %927 = vmatpush.bf16.msrb.mxu1 %v906_v16  ;;  %v2637_v16 = vld [vmem:[%s3544_s3 + $0xb8] sm:$0xf] }
  0x4a   : > { %912 = vmatpush.bf16.msra.mxu0 %v2935_v25  ;;  %807 = vmatpush.bf16.msrb.mxu2 %v2924_v27 }
  0x4c   : > { %1016 = vmatpush.bf16.msrb.mxu3 %v2947_v19  ;;  %v2638_v19 = vor.u32 %v2991_v17, %v2637_v16  ;;  %v3031_v17 = vld [vmem:[%s3544_s3 + $0x1f8] sm:$0x10] }
  0x4d   : > { %928 = vmatpush.bf16.msrb.mxu1 %v2940_v21  ;;  %v2999_v21 = vld [vmem:[%s3544_s3 + $0xf8] sm:$0x10] }
  0x4e   : > { %913 = vmatpush.bf16.msra.mxu0 %v2934_v33  ;;  %808 = vmatpush.bf16.msrb.mxu2 %v2923_v36  ;;  %v2687_v23 = vor.u32 %v2999_v21, %v2686_v20  ;;  %v1510_v25 = vand.u32 %v2638_v19, %v3269_v13  ;;  %v2990_v33 = vld [vmem:[%s3544_s3 + $0xb0] sm:$0xff]  ;;  %v2973_v36 = vld [vmem:[%s3544_s3 + $0x28] sm:$0xff]  ;;  %v2992_v20 = vld [vmem:[%s3544_s3 + $0xc0] sm:$0xff] }
  0x50   : > { %1017 = vmatpush.bf16.msrb.mxu3 %v2946_v26  ;;  %2284 = vmatmul.msk.bf16.vlgmr.msra.gmra.mxu1 %vm363_vm2, %v3142_v29  ;;  %v1595_v30 = vand.u32 %v2687_v23, %v3269_v13 }
  0x51   : > { %1122 = vmatpush.bf16.msra.mxu1 %v2957_v37  ;;  %809 = vmatmul.bf16.vlgmr.msrb.gmra.mxu2 %v3170_v54  ;;  %v2998_v37 = vld [vmem:[%s3544_s3 + $0xf0] sm:$0xff] }
  0x52   : > { %1034 = vmatpush.bf16.msra.mxu2 %v1013_v38  ;;  %914 = vmatpush.bf16.msra.mxu0 %v2933_v39  ;;  %v2981_v39 = vld [vmem:[%s3544_s3 + $0x68] sm:$0xff] }
  0x54   : > { %1018 = vmatpush.bf16.msrb.mxu3 %v2945_v34 }
  0x55   : > { %1123 = vmatpush.bf16.msra.mxu1 %v2956_v42 }
  0x56   : > { %1035 = vmatpush.bf16.msra.mxu2 %v2949_v43  ;;  %915 = vmatpush.bf16.msra.mxu0 %v2932_v45  ;;  %v2997_v43 = vld [vmem:[%s3544_s3 + $0xe8] sm:$0xff]  ;;  %v2988_v45 = vld [vmem:[%s3544_s3 + $0xa0] sm:$0xff] }
  0x58   : > { %1019 = vmatpush.bf16.msrb.mxu3 %v2944_v40  ;;  %v2989_v40 = vld [vmem:[%s3544_s3 + $0xa8] sm:$0xff] }
  0x59   : > { %1124 = vmatpush.bf16.msra.mxu1 %v2955_v48  ;;  %916 = vmatmul.bf16.vlgmr.msra.gmra.mxu0 %v3170_v54  ;;  %v2971_v48 = vld [vmem:[%s3544_s3 + $0x18] sm:$0xff] }
  0x5a   : > { %1229 = vmatpush.bf16.msrb.mxu2 %v2966_v44  ;;  %1141 = vmatpush.bf16.msrb.mxu0 %v1120_v47  ;;  %v2980_v44 = vld [vmem:[%s3544_s3 + $0x60] sm:$0xff] }
  0x5c   : > { %1020 = vmatpush.bf16.msrb.mxu3 %v2943_v46 }
  0x5d   : > { %1125 = vmatpush.bf16.msra.mxu1 %v2954_v8  ;;  %v2970_v8 = vld [vmem:[%s3544_s3 + $0x10] sm:$0xff] }
  0x5e   : > { %1230 = vmatpush.bf16.msrb.mxu2 %v2965_v49  ;;  %1142 = vmatpush.bf16.msrb.mxu0 %v2958_v52  ;;  %v2996_v49 = vld [vmem:[%s3544_s3 + $0xe0] sm:$0xff] }
  0x60   : > { %1021 = vmatpush.bf16.msrb.mxu3 %v2942_v51  ;;  %2340 = vmatmul.msk.bf16.vlgmr.msrb.gmra.mxu1 %vm363_vm2, %v3142_v29  ;;  %v2987_v51 = vld [vmem:[%s3544_s3 + $0x98] sm:$0xff] }
  0x61   : > { %1126 = vmatpush.bf16.msra.mxu1 %v2953_v57  ;;  %2396 = vmatmul.msk.bf16.vlgmr.msra.gmra.mxu2 %vm363_vm2, %v3142_v29 }
  0x62   : > { %1231 = vmatpush.bf16.msrb.mxu2 %v2964_v55  ;;  %1340 = vmatpush.bf16.msra.mxu0 %v1338_v14  ;;  %v2978_v55 = vld [vmem:[%s3544_s3 + $0x50] sm:$0xff]  ;;  %v2882_v14 = vld [vmem:[%s3544_s3 + $0x1f8] sm:$0xf] }
  0x63   : > { %v2883_v21 = vor.u32 %v3031_v17, %v2882_v14 }
  0x64   : > { %1022 = vmatpush.bf16.msrb.mxu3 %v2941_v56  ;;  %v2986_v56 = vld [vmem:[%s3544_s3 + $0x90] sm:$0xff] }
  0x65   : > { %1127 = vmatpush.bf16.msra.mxu1 %v2952_v59  ;;  %v2969_v59 = vld [vmem:[%s3544_s3 + $0x8] sm:$0xff] }
  0x66   : > { %1232 = vmatpush.bf16.msrb.mxu2 %v2963_v58  ;;  %1341 = vmatpush.bf16.msra.mxu0 %v2974_v28  ;;  %v3014_v28 = vld [vmem:[%s3544_s3 + $0x170] sm:$0xff] }
  0x67   : > { %1023 = vmatmul.bf16.vlgmr.msrb.gmra.mxu3 %v3170_v54 }
  0x68   : > { %1248 = vmatpush.bf16.msra.mxu3 %v1227_v32  ;;  %v2982_v32 = vld [vmem:[%s3544_s3 + $0x70] sm:$0xff] }
  0x69   : > { %1128 = vmatpush.bf16.msra.mxu1 %v2951_v62  ;;  %2452 = vmatmul.msk.bf16.vlgmr.msrb.gmra.mxu0 %vm363_vm2, %v3142_v29  ;;  %v2985_v62 = vld [vmem:[%s3544_s3 + $0x88] sm:$0xff] }
  0x6a   : > { %1233 = vmatpush.bf16.msrb.mxu2 %v2962_v61  ;;  %1342 = vmatpush.bf16.msra.mxu0 %v2973_v36  ;;  %v2977_v61 = vld [vmem:[%s3544_s3 + $0x48] sm:$0xff] }
  0x6b   : > { %v3021_v36 = vld [vmem:[%s3544_s3 + $0x1a8] sm:$0xff] }
  0x6c   : > { %1249 = vmatpush.bf16.msra.mxu3 %v2967_v60  ;;  %v2994_v60 = vld [vmem:[%s3544_s3 + $0xd0] sm:$0xff] }
  0x6d   : > { %1129 = vmatpush.bf16.msra.mxu1 %v2950_v0 }
  0x6e   : > { %1234 = vmatpush.bf16.msrb.mxu2 %v2961_v63  ;;  %1343 = vmatpush.bf16.msra.mxu0 %v2972_v41  ;;  %v2968_v63 = vld [vmem:[%s3544_s3] sm:$0xff] }
  0x6f   : > { %v3012_v41 = vld [vmem:[%s3544_s3 + $0x160] sm:$0xff] }
  0x70   : > { %1130 = vmatmul.bf16.vlgmr.msra.gmra.mxu1 %v3170_v54  ;;  %1512 = vmatpush.bf16.msrb.mxu3 %v1510_v25  ;;  %v1935_v25 = vand.u32 %v2883_v21, %v3269_v13 }
  0x72   : > { %1235 = vmatpush.bf16.msrb.mxu2 %v2960_v2  ;;  %1344 = vmatpush.bf16.msra.mxu0 %v2971_v48  ;;  %v2993_v2 = vld [vmem:[%s3544_s3 + $0xc8] sm:$0xff]  ;;  %v3019_v48 = vld [vmem:[%s3544_s3 + $0x198] sm:$0xff] }
  0x74   : > { %1513 = vmatpush.bf16.msrb.mxu3 %v2990_v33  ;;  %v3030_v33 = vld [vmem:[%s3544_s3 + $0x1f0] sm:$0xff] }
  0x76   : > { %1236 = vmatpush.bf16.msrb.mxu2 %v2959_v3  ;;  %1345 = vmatpush.bf16.msra.mxu0 %v2970_v8  ;;  %v2735_v3 = vld [vmem:[%s3544_s3 + $0x138] sm:$0xf]  ;;  %v3002_v8 = vld [vmem:[%s3544_s3 + $0x110] sm:$0xff] }
  0x77   : > { %2508 = vmatmul.msk.bf16.vlgmr.msra.gmra.mxu3 %vm363_vm2, %v3142_v29 }
  0x78   : > { %1514 = vmatpush.bf16.msrb.mxu3 %v2989_v40  ;;  %v3029_v40 = vld [vmem:[%s3544_s3 + $0x1e8] sm:$0xff] }
  0x79   : > { %1237 = vmatmul.bf16.vlgmr.msrb.gmra.mxu2 %v3170_v54  ;;  %v2588_v54 = vld [vmem:[%s3544_s3 + $0x78] sm:$0xf] }
  0x7a   : > { %v2589_v15 = vor.u32 %v2983_v1, %v2588_v54  ;;  %1597 = vmatpush.bf16.msra.mxu2 %v1595_v30  ;;  %1346 = vmatpush.bf16.msra.mxu0 %v2969_v59  ;;  %v2984_v54 = vld [vmem:[%s3544_s3 + $0x80] sm:$0xff]  ;;  %v2834_v1 = vor.u32 %v3023_v11, %v2833_v9  ;;  %v3022_v30 = vld [vmem:[%s3544_s3 + $0x1b0] sm:$0xff] }
  0x7b   : > { %v3026_v59 = vld [vmem:[%s3544_s3 + $0x1d0] sm:$0xff] }
  0x7c   : > { %v1424_v22 = vand.u32 %v2589_v15, %v3269_v13  ;;  %1515 = vmatpush.bf16.msrb.mxu3 %v2988_v45  ;;  %v1850_v19 = vand.u32 %v2834_v1, %v3269_v13 }
  0x7e   : > { %1426 = vmatpush.bf16.msrb.mxu1 %v1424_v22  ;;  %1598 = vmatpush.bf16.msra.mxu2 %v2998_v37 }
  0x7f   : > { %1347 = vmatpush.bf16.msra.mxu0 %v2968_v63 }
  0x80   : > { %1516 = vmatpush.bf16.msrb.mxu3 %v2987_v51 }
  0x82   : > { %1427 = vmatpush.bf16.msrb.mxu1 %v2982_v32  ;;  %1599 = vmatpush.bf16.msra.mxu2 %v2997_v43  ;;  %v3005_v32 = vld [vmem:[%s3544_s3 + $0x128] sm:$0xff]  ;;  %v3003_v43 = vld [vmem:[%s3544_s3 + $0x118] sm:$0xff] }
  0x84   : > { %1517 = vmatpush.bf16.msrb.mxu3 %v2986_v56  ;;  %v3018_v56 = vld [vmem:[%s3544_s3 + $0x190] sm:$0xff] }
  0x86   : > { %1428 = vmatpush.bf16.msrb.mxu1 %v2981_v39  ;;  %1600 = vmatpush.bf16.msra.mxu2 %v2996_v49  ;;  %v3004_v39 = vld [vmem:[%s3544_s3 + $0x120] sm:$0xff] }
  0x88   : > { %1518 = vmatpush.bf16.msrb.mxu3 %v2985_v62  ;;  %v3017_v62 = vld [vmem:[%s3544_s3 + $0x188] sm:$0xff] }
  0x8a   : > { %1429 = vmatpush.bf16.msrb.mxu1 %v2980_v44  ;;  %1601 = vmatpush.bf16.msra.mxu2 %v2995_v53  ;;  %v3028_v44 = vld [vmem:[%s3544_s3 + $0x1e0] sm:$0xff]  ;;  %v3027_v53 = vld [vmem:[%s3544_s3 + $0x1d8] sm:$0xff] }
  0x8c   : > { %1519 = vmatpush.bf16.msrb.mxu3 %v2984_v54 }
  0x8e   : > { %1430 = vmatpush.bf16.msrb.mxu1 %v2979_v50  ;;  %1602 = vmatpush.bf16.msra.mxu2 %v2994_v60  ;;  %v3009_v60 = vld [vmem:[%s3544_s3 + $0x148] sm:$0xff] }
  0x90   : > { %1852 = vmatpush.bf16.msra.mxu3 %v1850_v19 }
  0x92   : > { %1431 = vmatpush.bf16.msrb.mxu1 %v2978_v55  ;;  %1603 = vmatpush.bf16.msra.mxu2 %v2993_v2  ;;  %v3010_v55 = vld [vmem:[%s3544_s3 + $0x150] sm:$0xff] }
  0x94   : > { %1853 = vmatpush.bf16.msra.mxu3 %v3022_v30 }
  0x96   : > { %1432 = vmatpush.bf16.msrb.mxu1 %v2977_v61  ;;  %1604 = vmatpush.bf16.msra.mxu2 %v2992_v20 }
  0x98   : > { %1854 = vmatpush.bf16.msra.mxu3 %v3021_v36  ;;  %v1264_v36 = vld [vmem:[%s3545_s4] sm:$0x1] }
  0x9a   : > { %1937 = vmatpush.bf16.msrb.mxu2 %v1935_v25 }
  0x9d   : > { %v396_v4 = vpop.f32.mrf.mxu1 }
  0x9e   : > { %1938 = vmatpush.bf16.msrb.mxu2 %v3030_v33 }
  0xa2   : > { %v502_v5 = vpop.f32.mrf.mxu3  ;;  %1939 = vmatpush.bf16.msrb.mxu2 %v3029_v40 }
  0xa5   : > { %v398_v6 = vpop.f32.mrf.mxu1 }
  0xa6   : > { %v2784_v6 = vld [vmem:[%s3544_s3 + $0x178] sm:$0xf]  ;;  %1940 = vmatpush.bf16.msrb.mxu2 %v3028_v44 }
  0xaa   : > { %v504_v7 = vpop.f32.mrf.mxu3  ;;  %1941 = vmatpush.bf16.msrb.mxu2 %v3027_v53 }
  0xab   : > { %v3015_v7 = vld [vmem:[%s3544_s3 + $0x178] sm:$0x10] }
  0xac   : > { %v2785_v10 = vor.u32 %v3015_v7, %v2784_v6  ;;  %v3016_v6 = vld [vmem:[%s3544_s3 + $0x180] sm:$0xff] }
  0xae   : > { %v1765_v16 = vand.u32 %v2785_v10, %v3269_v13  ;;  %1942 = vmatpush.bf16.msrb.mxu2 %v3026_v59  ;;  %v3024_v10 = vld [vmem:[%s3544_s3 + $0x1c0] sm:$0xff] }
  0xb0   : > { %v383_v29 = vpop.f32.mrf.mxu0 }
  0xb1   : > { %v3294_v26 = vadd.f32 %v396_v4, %v383_v29  ;;  %v3007_v4 = vld [vmem:[%s3544_s3 + $0x138] sm:$0x10]  ;;  %v2976_v29 = vld [vmem:[%s3544_s3 + $0x40] sm:$0xff] }
  0xb2   : > { %v3284_v18 = vpop.f32.mrf.mxu3  ;;  %1433 = vmatpush.bf16.msrb.mxu1 %v2976_v29 }
  0xb4   : > { %v489_v24 = vpop.f32.mrf.mxu2 }
  0xb5   : > { %v3296_v27 = vadd.f32 %v502_v5, %v489_v24  ;;  %v2736_v5 = vor.u32 %v3007_v4, %v2735_v3  ;;  %v3006_v24 = vld [vmem:[%s3544_s3 + $0x130] sm:$0xff]  ;;  %v3000_v3 = vld [vmem:[%s3544_s3 + $0x100] sm:$0xff] }
  0xb6   : > { %1767 = vmatpush.bf16.msra.mxu1 %v1765_v16 }
  0xb7   : > { %v506_v31 = vmax.f32 %v3294_v26, %v3296_v27  ;;  %v1680_v12 = vand.u32 %v2736_v5, %v3269_v13  ;;  %v3008_v5 = vld [vmem:[%s3544_s3 + $0x140] sm:$0xff] }
  0xb8   : > { %v385_v35 = vpop.f32.mrf.mxu0 }
  0xb9   : > { %1682 = vmatpush.bf16.msrb.mxu0 %v1680_v12  ;;  %v3013_v35 = vld [vmem:[%s3544_s3 + $0x168] sm:$0xff] }
  0xba   : > { %v611_v38 = vpop.f32.mrf.mxu3  ;;  %1768 = vmatpush.bf16.msra.mxu1 %v3014_v28 }
  0xbc   : > { %v491_v42 = vpop.f32.mrf.mxu2 }
  0xbd   : > { %v3310_v34 = vpop.f32.mrf.mxu1  ;;  %1683 = vmatpush.bf16.msrb.mxu0 %v3006_v24  ;;  %v3020_v42 = vld [vmem:[%s3544_s3 + $0x1a0] sm:$0xff] }
  0xbe   : > { %1769 = vmatpush.bf16.msra.mxu1 %v3013_v35  ;;  %1855 = vmatpush.bf16.msra.mxu3 %v3020_v42  ;;  %v610_v61 = vadd.f32 %v3284_v18, %v3310_v34  ;;  %v3025_v18 = vld [vmem:[%s3544_s3 + $0x1c8] sm:$0xff] }
  0xbf   : > { %1943 = vmatpush.bf16.msrb.mxu2 %v3025_v18 }
  0xc0   : > { %v3336_v47 = vpop.f32.mrf.mxu0 }
  0xc1   : > { %1684 = vmatpush.bf16.msrb.mxu0 %v3005_v32 }
  0xc2   : > { %1770 = vmatpush.bf16.msra.mxu1 %v3012_v41  ;;  %1856 = vmatpush.bf16.msra.mxu3 %v3019_v48 }
  0xc3   : > { %1944 = vmatpush.bf16.msrb.mxu2 %v3024_v10 }
  0xc5   : > { %v598_v46 = vpop.f32.mrf.mxu1  ;;  %1685 = vmatpush.bf16.msrb.mxu0 %v3004_v39 }
  0xc6   : > { %v3011_v46 = vld [vmem:[%s3544_s3 + $0x158] sm:$0xff]  ;;  %1857 = vmatpush.bf16.msra.mxu3 %v3018_v56 }
  0xc7   : > { %1771 = vmatpush.bf16.msra.mxu1 %v3011_v46 }
  0xc8   : > { %v718_v58 = vpop.f32.mrf.mxu0 }
  0xc9   : > { %1686 = vmatpush.bf16.msrb.mxu0 %v3003_v43  ;;  %v3001_v58 = vld [vmem:[%s3544_s3 + $0x108] sm:$0xff] }
  0xca   : > { %v3350_v52 = vpop.f32.mrf.mxu3  ;;  %1858 = vmatpush.bf16.msra.mxu3 %v3017_v62 }
  0xcb   : > { %1772 = vmatpush.bf16.msra.mxu1 %v3010_v55 }
  0xcd   : > { %v3364_v57 = vpop.f32.mrf.mxu1  ;;  %1687 = vmatpush.bf16.msrb.mxu0 %v3002_v8 }
  0xce   : > { %1859 = vmatpush.bf16.msra.mxu3 %v3016_v6 }
  0xcf   : > { %1773 = vmatpush.bf16.msra.mxu1 %v3009_v60  ;;  %v1952_v60 = vld [vmem:[%s3546_s5] sm:$0x1] }
  0xd1   : > { %1688 = vmatpush.bf16.msrb.mxu0 %v3001_v58 }
  0xd2   : > { %v705_v0 = vpop.f32.mrf.mxu3 }
  0xd3   : > { %v717_v0 = vadd.f32 %v3336_v47, %v3350_v52  ;;  %v613_v47 = vmax.f32 %v506_v31, %v610_v61  ;;  %1774 = vmatpush.bf16.msra.mxu1 %v3008_v5 }
  0xd4   : > { %v3420_v22 = vpop.f32.mrf.mxu2 }
  0xd5   : > { %v825_v15 = vpop.f32.mrf.mxu1  ;;  %v824_v52 = vadd.f32 %v3364_v57, %v3420_v22  ;;  %v720_v7 = vmax.f32 %v613_v47, %v717_v0  ;;  %1689 = vmatpush.bf16.msrb.mxu0 %v3000_v3  ;;  %v1957_v3 = vld [vmem:[#allocation2] sm:$0x1] }
  0xd6   : > { %v3422_v23 = vpop.f32.mrf.mxu0  ;;  %v1260_v15 = vpop.permute.xlu0 %1259 }
  0xd7   : > { %v827_v26 = vmax.f32 %v720_v7, %v824_v52 }
  0xdc   : > { %v812_v37 = vpop.f32.mrf.mxu2 }
  0xdd   : > { %v930_v13 = vpop.f32.mrf.mxu1 }
  0xde   : > { %v919_v38 = vpop.f32.mrf.mxu0  ;;  %v931_v9 = vadd.f32 %v930_v13, %v3422_v23 }
  0xe0   : > { %v934_v57 = vmax.f32 %v827_v26, %v931_v9 }
  0xe4   : > { %v1037_v50 = vpop.f32.mrf.mxu2 }
  0xe5   : > { %v932_v45 = vpop.f32.mrf.mxu1 }
  0xe6   : > { %v1144_v51 = vpop.f32.mrf.mxu0 }
  0xea   : > { %v1024_v49 = vpop.f32.mrf.mxu3 }
  0xeb   : > { %v1038_v27 = vadd.f32 %v1037_v50, %v1024_v49 }
  0xec   : > { %v1039_v34 = vpop.f32.mrf.mxu2 }
  0xed   : > { %v1131_v63 = vpop.f32.mrf.mxu1  ;;  %v1041_v29 = vmax.f32 %v934_v57, %v1038_v27 }
  0xee   : > { %v1146_v4 = vpop.f32.mrf.mxu0  ;;  %v1145_v11 = vadd.f32 %v1144_v51, %v1131_v63 }
  0xf0   : > { %v1148_v1 = vmax.f32 %v1041_v29, %v1145_v11 }
  0xf2   : > { %v1026_v2 = vpop.f32.mrf.mxu3 }
  0xf5   : > { %v1133_v31 = vpop.f32.mrf.mxu1 }
  0xfa   : > { %v1251_v12 = vpop.f32.mrf.mxu3 }
  0xfc   : > { %v1238_v54 = vpop.f32.mrf.mxu2 }
  0xfd   : > { %v1252_v14 = vadd.f32 %v1251_v12, %v1238_v54 }
  0xff   : > { %v1255_v16 = vmax.f32 %v1148_v1, %v1252_v14 }
 0x101   : > { %v1262_v17 = vadd.f32 %v1260_v15, %v1255_v16 }
 0x102   : > { %v1253_v19 = vpop.f32.mrf.mxu3 }
 0x103   : > { %v1263_v20 = vmax.f32 %v1262_v17, 0.0 }
 0x104   : > { %v1240_v21 = vpop.f32.mrf.mxu2 }
 0x105   : > { %v1265_v22 = vpack.c.bf16 %v1263_v20, %v1263_v20 }
 0x107   : > { %2541 = vmatmul.msk.bf16.vlgmr.msra.gmra.mxu0 %vm1329_vm5, %v1265_v22  ;;  %v1371_v23 = vshrl.u32 %v1265_v22, 16  ;;  %v1458_v24 = vrot.slane %v1265_v22, 1  ;;  %v1628_v28 = vrot.slane %v1265_v22, 2  ;;  %v1798_v32 = vrot.slane %v1265_v22, 3 }
 0x109   : > { %2590 = vmatmul.msk.bf16.vlgmr.msrb.gmra.mxu1 %vm1329_vm5, %v1371_v23  ;;  %2639 = vmatmul.msk.bf16.vlgmr.msrb.gmra.mxu3 %vm1329_vm5, %v1458_v24  ;;  %v1543_v25 = vrot.slane %v1371_v23, 1  ;;  %v1713_v30 = vrot.slane %v1371_v23, 2  ;;  %v1883_v33 = vrot.slane %v1371_v23, 3 }
 0x10b   : > { %2688 = vmatmul.msk.bf16.vlgmr.msra.gmra.mxu2 %vm1329_vm5, %v1543_v25 }
 0x117   : > { %2737 = vmatmul.msk.bf16.vlgmr.msrb.gmra.mxu0 %vm1329_vm5, %v1628_v28 }
 0x119   : > { %2786 = vmatmul.msk.bf16.vlgmr.msra.gmra.mxu1 %vm1329_vm5, %v1713_v30  ;;  %2835 = vmatmul.msk.bf16.vlgmr.msra.gmra.mxu3 %vm1329_vm5, %v1798_v32 }
 0x11b   : > { %2884 = vmatmul.msk.bf16.vlgmr.msrb.gmra.mxu2 %vm1329_vm5, %v1883_v33 }
 0x184   : > { %v1349_v13 = vpop.f32.mrf.mxu0 }
 0x185   : > { %v1353_v37 = vadd.f32 %v1349_v13, %v1264_v36 }
 0x186   : > { %v1435_v35 = vpop.f32.mrf.mxu1 }
 0x187   : > { %v1439_v42 = vadd.f32 %v1435_v35, %v1353_v37 }
 0x18c   : > { %v1351_v38 = vpop.f32.mrf.mxu0  ;;  %v1521_v39 = vpop.f32.mrf.mxu3 }
 0x18d   : > { %v1525_v43 = vadd.f32 %v1521_v39, %v1439_v42 }
 0x18e   : > { %v1437_v40 = vpop.f32.mrf.mxu1  ;;  %v1606_v41 = vpop.f32.mrf.mxu2 }
 0x18f   : > { %v1610_v46 = vadd.f32 %v1606_v41, %v1525_v43 }
 0x194   : > { %v1523_v44 = vpop.f32.mrf.mxu3  ;;  %v1691_v45 = vpop.f32.mrf.mxu0 }
 0x195   : > { %v1695_v50 = vadd.f32 %v1691_v45, %v1610_v46 }
 0x196   : > { %v1608_v48 = vpop.f32.mrf.mxu2  ;;  %v1776_v49 = vpop.f32.mrf.mxu1 }
 0x197   : > { %v1780_v51 = vadd.f32 %v1776_v49, %v1695_v50 }
 0x19c   : > { %v1693_v8 = vpop.f32.mrf.mxu0  ;;  %v1861_v53 = vpop.f32.mrf.mxu3 }
 0x19d   : > { %v1865_v55 = vadd.f32 %v1861_v53, %v1780_v51 }
 0x19e   : > { %v1778_v56 = vpop.f32.mrf.mxu1  ;;  %v1946_v58 = vpop.f32.mrf.mxu2 }
 0x19f   : > { %v1950_v59 = vadd.f32 %v1946_v58, %v1865_v55 }
 0x1a1   : > { %v1951_v61 = vmax.f32 %v1950_v59, 0.0 }
 0x1a3   : > { %v1953_v62 = vmul.f32 %v1952_v60, %v1951_v61 }
 0x1a4   : > { %v1863_v63 = vpop.f32.mrf.mxu3 }
 0x1a5   : > { %v1954_v0 = vsel %vm367_vm0, %v1953_v62, 0.0 }
 0x1a6   : > { %v1948_v2 = vpop.f32.mrf.mxu2  ;;  %1955 = vadd.xlane.f32.xlu0 %v1954_v0 }
 0x219   : > { %v1956_v18 = vpop.xlane.xlu0 %1955 }
 0x21a   : > { %v1958_v34 = vadd.f32 %v1957_v3, %v1956_v18 }
 0x21c   : > { %3033 = vpush %v1958_v34 }
 0x24d   : > { %s3034_s10 = spop %3033 }
 0x24e   : > { %v1961_v4 = vstv %s3034_s10 }
 0x24f   : > { %1963 = vst [vmem:[%s278_s9] sm:$0xff] %v1961_v4 }
 0x250 PF: > { %s19_s26 = sadd.s32 1, %s3052_s26  }
 0x251   : > { %p16_p4 = scmp.ge.s32.totalorder %s19_s26, 4  }
 0x253   :  { %18 = sbr.rel (!%p16_p4) target bundleno = 3 (0x3), region = 93 }

</bundles_post_ra>
